<compile_context>
chip_gen: v5e
topology: v5e:2x2
jax: 0.10.0
libtpu: 0.0.40
codegen_flags: <defaults>
</compile_context>

<pallas_src>
import jax
import jax.numpy as jnp
from jax import lax
from jax.experimental import pallas as pl
from jax.experimental.pallas import tpu as pltpu

LANE = 128
SUBLANE = 8  # f32 sublane tile height


def _cdiv(a, b):
    return -(-a // b)


def _chip_config():
    """(block_bytes, num_slices_max, vmem_limit_cap) for the local chip.

    v5e/v6e: 128 MiB VMEM, 1 TensorCore -> big blocks, single slice.
    v7x    :  64 MiB VMEM, 2 TensorCores -> smaller blocks, 2 parallel slices.
    Unknown: conservative v7x-safe settings (correct & harmless everywhere).
    """
    vmem = None
    try:
        get_info = getattr(pltpu, "get_tpu_info", None)
        if get_info is not None:
            vmem = getattr(get_info(), "vmem_capacity_bytes", None)
    except Exception:  # detection is best-effort only
        vmem = None
    if vmem is not None and vmem >= 100 * (1 << 20):
        return (16 << 20), 1, (96 << 20)   # v5e / v6e
    return (8 << 20), 2, (48 << 20)        # v7x (or unknown)


def _make_kernel(rows, tile_r, steps_per_slice, acc_rows, needs_mask):
    """Per-slice sum of squared diffs -> (1, acc_rows, LANE) partial block."""
    groups = tile_r // acc_rows

    def kernel(s_ref, t_ref, o_ref):
        c = pl.program_id(0)   # parallel slice (one per TensorCore on v7x)
        i = pl.program_id(1)   # sequential reduction step within the slice

        @pl.when(i == 0)
        def _():
            o_ref[...] = jnp.zeros_like(o_ref)

        # Logical (unclamped) start row of this block.
        row0 = (c * steps_per_slice + i) * tile_r

        def sq_diff():
            d = s_ref[...].astype(jnp.float32) - t_ref[...].astype(jnp.float32)
            return d * d

        def accumulate(d2):
            # acc_rows/8 independent (8,128) accumulation chains (pure VPU);
            # the cross-sublane/lane collapse is deferred to JAX.
            o_ref[...] += d2.reshape(groups, acc_rows, LANE).sum(axis=0)[None]

        if not needs_mask:
            accumulate(sq_diff())
        else:
            interior = row0 + tile_r <= rows
            tail = jnp.logical_and(row0 < rows, jnp.logical_not(interior))

            @pl.when(interior)
            def _():
                accumulate(sq_diff())   # fast path: no iota / select

            @pl.when(tail)
            def _():
                # Only the single block straddling `rows` pays the mask cost.
                row_ids = row0 + lax.broadcasted_iota(
                    jnp.int32, (tile_r, LANE), 0)
                accumulate(jnp.where(row_ids < rows, sq_diff(), 0.0))
            # Fully out-of-range (clamped duplicate) blocks: no compute.

    return kernel


def _mse_partial_sums(s2, t2):
    """Sum of (s - t)^2 over a (rows, 128) view, via a streaming kernel."""
    rows = s2.shape[0]
    itemsize = jnp.dtype(s2.dtype).itemsize
    sub = SUBLANE * max(1, 4 // itemsize)       # dtype sublane packing

    block_bytes, num_slices_max, vmem_cap = _chip_config()
    # Constant block *bytes* regardless of dtype.
    target_tile_r = max(sub, (block_bytes // (LANE * itemsize)) // sub * sub)
    tile_r = min(target_tile_r, (rows // sub) * sub)

    total_blocks = _cdiv(rows, tile_r)
    num_slices = min(num_slices_max, total_blocks)
    steps_per_slice = _cdiv(total_blocks, num_slices)
    needs_mask = (num_slices * steps_per_slice * tile_r) != rows

    # Widest accumulator (up to 64 rows = 8 parallel vreg chains) dividing tile_r.
    acc_rows = SUBLANE
    for cand in (64, 32, 16, 8):
        if tile_r % cand == 0:
            acc_rows = cand
            break

    def in_map(c, i):
        # Clamp so every DMA targets an in-bounds block; logically-OOB
        # duplicate blocks are skipped inside the kernel.
        return (jnp.minimum(c * steps_per_slice + i, total_blocks - 1), 0)

    kernel = _make_kernel(rows, tile_r, steps_per_slice, acc_rows, needs_mask)

    block_vmem = tile_r * LANE * itemsize
    # 2 inputs x 2 pipeline buffers + headroom for output block / internal scratch.
    vmem_limit = int(min(vmem_cap, 4 * block_vmem + (16 << 20)))

    partials = pl.pallas_call(
        kernel,
        out_shape=jax.ShapeDtypeStruct((num_slices, acc_rows, LANE), jnp.float32),
        grid_spec=pltpu.PrefetchScalarGridSpec(
            num_scalar_prefetch=0,
            grid=(num_slices, steps_per_slice),
            in_specs=[
                pl.BlockSpec((tile_r, LANE), in_map),
                pl.BlockSpec((tile_r, LANE), in_map),
            ],
            out_specs=pl.BlockSpec((1, acc_rows, LANE), lambda c, i: (c, 0, 0)),
        ),
        compiler_params=pltpu.CompilerParams(
            dimension_semantics=("parallel", "arbitrary"),
            vmem_limit_bytes=vmem_limit,
        ),
    )(s2, t2)

    return jnp.sum(partials)


def feature_alignment_loss(student_features, teacher_features):
    """Equivalent to torch.mean((student - teacher) ** 2) -> scalar f32."""
    assert student_features.shape == teacher_features.shape

    n = int(student_features.size)
    s_flat = student_features.reshape(-1)
    t_flat = teacher_features.reshape(-1)

    itemsize = jnp.dtype(student_features.dtype).itemsize
    sub = SUBLANE * max(1, 4 // itemsize)
    rows = n // LANE

    if rows < sub:
        # Tiny input (< a few KiB): a kernel launch is not worth it.
        d = s_flat.astype(jnp.float32) - t_flat.astype(jnp.float32)
        return jnp.sum(d * d) / jnp.float32(n)

    n_main = rows * LANE
    rem = n - n_main
    if rem:
        # Rare (n % 128 != 0): kernel streams the full-row prefix, the <128
        # element tail is reduced in plain JAX.  No full-array pad copy.
        s_main = lax.slice(s_flat, (0,), (n_main,))
        t_main = lax.slice(t_flat, (0,), (n_main,))
    else:
        # Common case: a free reshape, zero extra HBM traffic.
        s_main, t_main = s_flat, t_flat

    total = _mse_partial_sums(s_main.reshape(rows, LANE),
                              t_main.reshape(rows, LANE))

    if rem:
        d = (s_flat[n_main:].astype(jnp.float32)
             - t_flat[n_main:].astype(jnp.float32))
        total = total + jnp.sum(d * d)

    return total / jnp.float32(n)


if __name__ == "__main__":
    key = jax.random.PRNGKey(0)
    ks = jax.random.split(key, 8)

    def check(shape, ka, kb):
        s = jax.random.normal(ka, shape, dtype=jnp.float32)
        t = jax.random.normal(kb, shape, dtype=jnp.float32)
        got = jax.block_until_ready(feature_alignment_loss(s, t))
        ref = jnp.mean((s - t) ** 2)
        assert jnp.allclose(got, ref, rtol=1e-5, atol=1e-6), (shape, got, ref)

    # Small NCHW feature maps (n % 128 == 0, single unmasked block).
    check((2, 4, 16, 16), ks[0], ks[1])
    # Multi-block path: 2304 elems -> 18 rows -> interior block + masked tail.
    check((2, 3, 24, 16), ks[2], ks[3])
    # n % 128 != 0: kernel on the 9 full rows + <128-element JAX tail.
    check((2, 5, 11, 11), ks[4], ks[5])
    # Tiny input (< 1 row): pure JAX fallback path.
    check((3, 5, 7), ks[6], ks[7])

    print("KERNEL_OK")
</pallas_src>

<mosaic_0001>
module attributes {stable_mosaic.version = 11 : i64} {
  func.func @kernel(%arg0: i32, %arg1: i32, %arg2: memref<16x128xf32, #tpu.memory_space<vmem>>, %arg3: memref<16x128xf32, #tpu.memory_space<vmem>>, %arg4: memref<1x16x128xf32, #tpu.memory_space<vmem>>) attributes {dimension_semantics = [#tpu.dimension_semantics<parallel>, #tpu.dimension_semantics<arbitrary>], iteration_bounds = array<i64: 1, 1>, scalar_prefetch = 0 : i64, scratch_operands = 0 : i64, tpu.core_type = #tpu.core_type<tc>, window_params = [{transform_indices = @transform_0, window_bounds = array<i64: 16, 128>}, {transform_indices = @transform_1, window_bounds = array<i64: 16, 128>}, {transform_indices = @transform_2, window_bounds = array<i64: 1, 16, 128>}]} {
    %c0_i32 = arith.constant 0 : i32
    %0 = arith.cmpi eq, %arg1, %c0_i32 : i32
    %1 = arith.extui %0 : i1 to i32
    %c0_i32_0 = arith.constant 0 : i32
    %2 = arith.cmpi ne, %1, %c0_i32_0 : i32
    scf.if %2 {
      %cst_10 = arith.constant 0.000000e+00 : f32
      %13 = vector.broadcast %cst_10 : f32 to vector<1x16x128xf32>
      %c0_11 = arith.constant 0 : index
      %c0_12 = arith.constant 0 : index
      %c0_13 = arith.constant 0 : index
      %14 = vector.load %arg4[%c0_11, %c0_12, %c0_13] : memref<1x16x128xf32, #tpu.memory_space<vmem>>, vector<1x16x128xf32>
      tpu.vector_store %arg4[%c0_11, %c0_12, %c0_13], %13 {strides = array<i32>} : memref<1x16x128xf32, #tpu.memory_space<vmem>>, vector<1x16x128xf32>,
    } else {
    }
    %c0 = arith.constant 0 : index
    %c0_1 = arith.constant 0 : index
    %3 = vector.load %arg2[%c0, %c0_1] : memref<16x128xf32, #tpu.memory_space<vmem>>, vector<16x128xf32>
    %c0_2 = arith.constant 0 : index
    %c0_3 = arith.constant 0 : index
    %4 = vector.load %arg3[%c0_2, %c0_3] : memref<16x128xf32, #tpu.memory_space<vmem>>, vector<16x128xf32>
    %5 = arith.subf %3, %4 : vector<16x128xf32>
    %6 = arith.mulf %5, %5 : vector<16x128xf32>
    %c0_4 = arith.constant 0 : index
    %c0_5 = arith.constant 0 : index
    %c0_6 = arith.constant 0 : index
    %7 = vector.load %arg4[%c0_4, %c0_5, %c0_6] : memref<1x16x128xf32, #tpu.memory_space<vmem>>, vector<1x16x128xf32>
    %8 = vector.shape_cast %6 : vector<16x128xf32> to vector<1x16x128xf32>
    %cst = arith.constant dense<0.000000e+00> : vector<16x128xf32>
    %9 = vector.multi_reduction <add>, %8, %cst [0] : vector<1x16x128xf32> to vector<16x128xf32>
    %10 = vector.shape_cast %9 : vector<16x128xf32> to vector<1x16x128xf32>
    %11 = arith.addf %7, %10 : vector<1x16x128xf32>
    %c0_7 = arith.constant 0 : index
    %c0_8 = arith.constant 0 : index
    %c0_9 = arith.constant 0 : index
    %12 = vector.load %arg4[%c0_7, %c0_8, %c0_9] : memref<1x16x128xf32, #tpu.memory_space<vmem>>, vector<1x16x128xf32>
    tpu.vector_store %arg4[%c0_7, %c0_8, %c0_9], %11 {strides = array<i32>} : memref<1x16x128xf32, #tpu.memory_space<vmem>>, vector<1x16x128xf32>,
    return
  }
  func.func @transform_0(%arg0: i32, %arg1: i32) -> (i32, i32) {
    %c1_i32 = arith.constant 1 : i32
    %0 = arith.muli %arg0, %c1_i32 : i32
    %1 = arith.addi %0, %arg1 : i32
    %c0_i32 = arith.constant 0 : i32
    %2 = arith.minsi %1, %c0_i32 : i32
    %c0_i32_0 = arith.constant 0 : i32
    %c0_i32_1 = arith.constant 0 : i32
    return %2, %c0_i32_0 : i32, i32
  }
  func.func @transform_1(%arg0: i32, %arg1: i32) -> (i32, i32) {
    %c1_i32 = arith.constant 1 : i32
    %0 = arith.muli %arg0, %c1_i32 : i32
    %1 = arith.addi %0, %arg1 : i32
    %c0_i32 = arith.constant 0 : i32
    %2 = arith.minsi %1, %c0_i32 : i32
    %c0_i32_0 = arith.constant 0 : i32
    %c0_i32_1 = arith.constant 0 : i32
    return %2, %c0_i32_0 : i32, i32
  }
  func.func @transform_2(%arg0: i32, %arg1: i32) -> (i32, i32, i32) {
    %c0_i32 = arith.constant 0 : i32
    %c0_i32_0 = arith.constant 0 : i32
    %c0_i32_1 = arith.constant 0 : i32
    return %arg0, %c0_i32, %c0_i32_0 : i32, i32, i32
  }
}

</mosaic_0001>

<bundles_post_ra>
// kernel: tpu_custom_call.1
= control target key start
LH: loop header
LB: loop body
LE: loop exit
PB: predicated region body
PF: predicated region fallthrough
CT: control target
= control target key end

     0   :  { %7 = vsyncpa [#allocation3], 0  ;;  %s232_s0 = inlined_call_operand.hbm [shape: f32[16,128], index: 0, kind: input, shape index: {}]   ;;  %s233_s1 = inlined_call_operand.hbm [shape: f32[16,128], index: 1, kind: input, shape index: {}]   ;;  %s234_s2 = inlined_call_operand.hbm [shape: f32[1,16,128], index: 2, kind: output, shape index: {}]  }
   0x1   :  { %8 = vsyncpa [#allocation6], 0 }
   0x2   :  { %9 = vsyncpa [#allocation4], 0  ;;  %s20_s11 = sshll.u32 %s232_s0, 4  ;;  %s194_s12 = smov [#allocation2]   ;;  %s21_s11 = int_to_ptr.hbm [resolvable:$true] %s20_s11 }
   0x3   :  { %s22_s13 = sshll.u32 %s194_s12, 4  ;;  %s39_s16 = sshll.u32 %s233_s1, 4  ;;  %s23_s13 = int_to_ptr.vmem [resolvable:$true] %s22_s13  ;;  %s40_s16 = int_to_ptr.hbm [resolvable:$true] %s39_s16 }
   0x4   :  { %s195_s17 = smov 128   ;;  %s196_s18 = smov 8  }
   0x5   :  { %28 = dma.hbm_to_vmem [thread:$0]  %s21_s11, 256, %s23_s13, [#allocation3], %s195_s17, %s195_s17, %s196_s18  }
   0x6   :  { %s197_s19 = smov [#allocation5]  }
   0x7   :  { %s41_s20 = sshll.u32 %s197_s19, 4  ;;  %s42_s20 = int_to_ptr.vmem [resolvable:$true] %s41_s20 }
   0x8   :  { %47 = dma.hbm_to_vmem [thread:$0]  %s40_s16, 256, %s42_s20, [#allocation6], %s195_s17, %s195_s17, %s196_s18  }
   0x9   :  { %188 = dma.done.wait [#allocation3], 256  }
   0xa   :  { %189 = vsyncadd [#allocation3], 4294967040 }
   0xb   :  { %190 = dma.done.wait [#allocation6], 256  }
   0xc   :  { %191 = vsyncadd [#allocation6], 4294967040  ;;  %v70_v0 = vld [vmem:[#allocation2] sm:$0xff]  ;;  %v72_v1 = vld [vmem:[#allocation5] sm:$0xff]  ;;  %s198_s0 = smov [#allocation7]   ;;  %s92_s23 = sshll.u32 %s234_s2, 4  ;;  %s93_s23 = int_to_ptr.hbm [resolvable:$true] %s92_s23 }
   0xd   :  { %v71_v2 = vld [vmem:[#allocation2 + $0x8] sm:$0xff]  ;;  %v74_v3 = vsub.f32 %v70_v0, %v72_v1  ;;  %v73_v4 = vld [vmem:[#allocation5 + $0x8] sm:$0xff]  ;;  %s90_s1 = sshll.u32 %s198_s0, 4  ;;  %s91_s1 = int_to_ptr.vmem [resolvable:$true] %s90_s1 }
   0xe   :  { %v75_v5 = vsub.f32 %v71_v2, %v73_v4 }
   0xf   :  { %v76_v6 = vmul.f32 %v74_v3, %v74_v3 }
  0x10   :  { %v77_v7 = vmul.f32 %v75_v5, %v75_v5 }
  0x11   :  { %84 = vst [vmem:[#allocation7] sm:$0xff] %v76_v6 }
  0x12   :  { %85 = vst [vmem:[#allocation7 + $0x8] sm:$0xff] %v77_v7 }
  0x13   :  { %98 = dma.vmem_to_hbm [thread:$0]  %s91_s1, 256, %s93_s23, [#allocation4], %s195_s17, %s195_s17, %s196_s18  }
  0x14   :  { %192 = dma.done.wait [#allocation4], 256  }
  0x15   :  { %193 = vsyncadd [#allocation4], 4294967040 }
  0x16   :  { %103 = vsyncpa [#allocation3], 1 }
  0x17   :  { %104 = vsyncpa [#allocation6], 1 }
  0x18   :  { %105 = vsyncpa [#allocation4], 1 }

</bundles_post_ra>
